<compile_context>
chip_gen: v7x
topology: tpu7x:2x2x1
jax: 0.10.0
libtpu: 0.0.40
codegen_flags: <defaults>
</compile_context>

<pallas_src>
import functools

import jax
import jax.numpy as jnp
from jax import lax
from jax.experimental import pallas as pl
from jax.experimental.pallas import tpu as pltpu


# --------------------------------------------------------------------------- #
# Tiling helpers
# --------------------------------------------------------------------------- #
def _vmem_caps():
    """Returns (per-step working-set budget, Mosaic scoped-VMEM limit) bytes."""
    cap = 64 << 20                      # conservative fallback (v7x per-core VMEM)
    try:
        cap = int(getattr(pltpu.get_tpu_info(), "vmem_capacity_bytes", cap))
    except Exception:
        pass
    # Budget 1/4 of physical VMEM for the (already double-buffer-accounted)
    # working set; hand Mosaic 1/2 of physical as the scoped limit.
    return cap // 4, cap // 2


def _pick_channel_tile(c, per_chan_bytes, fixed_bytes, budget_bytes, max_tile):
    """Largest divisor of c (<= max_tile) whose working set fits the budget."""
    best = 1
    for d in range(1, c + 1):
        if c % d or d > max_tile:
            continue
        if per_chan_bytes * d + fixed_bytes <= budget_bytes:
            best = d
    return best


def _pick_row_tile(rows, row_bytes, budget_bytes, min_steps=4):
    """Largest row tile (divisor of rows, multiple of 8 or full) fitting budget,
    preferring tiles that leave >= min_steps grid steps (v7x: 2 TensorCores)."""
    divs = [d for d in range(1, rows + 1)
            if rows % d == 0 and (d % 8 == 0 or d == rows)]
    fit = [d for d in divs if 4 * d * row_bytes <= budget_bytes] or [divs[0]]
    pref = [d for d in fit if rows // d >= min_steps]
    return max(pref) if pref else max(fit)


# --------------------------------------------------------------------------- #
# Kernels
# --------------------------------------------------------------------------- #
def _static_norm_kernel(x_ref, inv_ref, o_ref):
    # x_ref / o_ref : (rt, L) lane-dense blocks
    # inv_ref       : (1,) SMEM scalar holding 1/squeeze_factor
    o_ref[...] = jnp.tanh(x_ref[...] * inv_ref[0])


def _dynamic_norm_kernel(x_ref, w_ref, sf_ref, o_ref, xs_ref, *, kh, kw, t, ct):
    # x_ref : (ct, A, L)    input block (batch dim squeezed), L = E*T lane-dense
    # w_ref : (C*kh*kw,)    SMEM: flat depthwise spatial weight table
    # sf_ref: (1,)          SMEM: squeeze factor
    # o_ref : (ct, A, L)    output block
    # xs_ref: (Ap, Lp)      VMEM scratch: zero-padded |x| halo for ONE channel
    p1 = (kh - 1) // 2
    p2 = (kw - 1) // 2
    _, A, L = x_ref.shape
    Ap, Lp = xs_ref.shape
    khkw = kh * kw

    sf = sf_ref[0]
    c0 = pl.program_id(1) * ct          # first global channel of this block

    # Zero only the halo border; the (A, L) interior is fully overwritten for
    # every channel below, so a full-scratch memset would be pure vst waste.
    if p1 > 0:
        xs_ref[pl.ds(0, p1), :] = jnp.zeros((p1, Lp), jnp.float32)
        xs_ref[pl.ds(p1 + A, p1), :] = jnp.zeros((p1, Lp), jnp.float32)
    if p2 > 0:
        xs_ref[:, pl.ds(0, p2 * t)] = jnp.zeros((Ap, p2 * t), jnp.float32)
        xs_ref[:, pl.ds(p2 * t + L, p2 * t)] = jnp.zeros((Ap, p2 * t), jnp.float32)

    def per_channel(c, carry):
        xc = x_ref[c]                                        # (A, L)
        # Single (lane-shifted) interior store of |x| for this channel.
        xs_ref[pl.ds(p1, A), pl.ds(p2 * t, L)] = jnp.abs(xc)

        wbase = (c0 + c) * khkw
        acc = None
        # Hoist the lane shift out of the sublane loop: one lane-offset column
        # load per kw tap column, reused across the kh sublane taps.
        for j in range(kw):
            col = xs_ref[:, pl.ds(j * t, L)]                 # (Ap, L)
            for i in range(kh):
                w = w_ref[wbase + i * kw + j]                # SMEM scalar splat
                term = col[i:i + A, :] * w
                acc = term if acc is None else acc + term

        # layer_temporal is a 1x1x1 depthwise conv with weight == 1 -> identity.
        nf = acc + sf
        # postprocess() clamps weights >= 0 and sf >= 1e-3, so nf > 0.  One
        # Newton step refines the EUP approximate reciprocal to ~f32 accuracy.
        r = pl.reciprocal(nf, approx=True)
        r = r * (2.0 - nf * r)
        o_ref[c] = jnp.tanh(xc * r).astype(o_ref.dtype)
        return carry

    lax.fori_loop(0, ct, per_channel, 0, unroll=bool(ct <= 8))


# --------------------------------------------------------------------------- #
# Wrapper
# --------------------------------------------------------------------------- #
def normalization_block_forward(x, *, mode, spatial_weight=None, squeeze_factor=None):
    """Forward pass of NormalizationBlock.

    x: (B, C, A, E, T) float32
    spatial_weight: (C, Kh, Kw) float32   (dynamic mode; depthwise, groups=C)
    squeeze_factor: scalar                (static & dynamic modes)
    """
    assert mode in ("none", "static", "dynamic")
    if mode == "none":
        return x

    B, C, A, E, T = x.shape
    L = E * T
    n_el = B * C * A * E * T
    budget, vmem_limit = _vmem_caps()

    if mode == "static":
        # Memory-bound: flatten to a lane-dense 2D view and row-tile into the
        # largest blocks that fit the budget (independent of B/C boundaries).
        R = B * C * A
        x2 = x.reshape(R, L)
        inv = (1.0 / jnp.asarray(squeeze_factor, jnp.float32)).reshape(1)
        rt = _pick_row_tile(R, 4 * L, budget)
        cost = pl.CostEstimate(flops=int(2 * n_el), transcendentals=int(n_el),
                               bytes_accessed=int(8 * n_el))
        out = pl.pallas_call(
            _static_norm_kernel,
            out_shape=jax.ShapeDtypeStruct(x2.shape, x.dtype),
            grid=(R // rt,),
            in_specs=[
                pl.BlockSpec((rt, L), lambda r: (r, 0)),
                pl.BlockSpec(memory_space=pltpu.MemorySpace.SMEM),
            ],
            out_specs=pl.BlockSpec((rt, L), lambda r: (r, 0)),
            compiler_params=pltpu.CompilerParams(
                dimension_semantics=("parallel",),
                vmem_limit_bytes=vmem_limit),
            cost_estimate=cost,
        )(x2, inv)
        return out.reshape(x.shape)

    # --- dynamic mode ---
    Kh, Kw = spatial_weight.shape[1], spatial_weight.shape[2]
    assert Kh % 2 == 1 and Kw % 2 == 1, "spatial kernel must be odd-sized"
    p1, p2 = (Kh - 1) // 2, (Kw - 1) // 2
    Ap, Lp = A + 2 * p1, (E + 2 * p2) * T

    # Lane-dense view: merge (E, T) into the minor dim (contiguous -> free).
    xr = x.reshape(B, C, A, L)
    sf = jnp.asarray(squeeze_factor, jnp.float32).reshape(1)
    wr = spatial_weight.astype(jnp.float32).reshape(C * Kh * Kw)

    # Working set per grid step: in + out blocks (each double-buffered) plus
    # the single-channel padded-|x| scratch.  The per-channel tap accumulator
    # lives in vregs, so it does not count against VMEM.
    per_chan_bytes = 4 * (4 * A * L)         # 2 bufs x (in + out) per channel
    fixed_bytes = 4 * Ap * Lp                # scratch (single-buffered)
    min_c_steps = max(1, -(-4 // B))         # keep grid >= 4 steps when possible
    max_ct = max(1, C // min_c_steps)
    ct = _pick_channel_tile(C, per_chan_bytes, fixed_bytes, budget, max_ct)

    cost = pl.CostEstimate(
        flops=int((2 * Kh * Kw + 6) * n_el),
        transcendentals=int(2 * n_el),
        bytes_accessed=int(8 * n_el + 4 * C * Kh * Kw))

    kernel = functools.partial(_dynamic_norm_kernel, kh=Kh, kw=Kw, t=T, ct=ct)
    out = pl.pallas_call(
        kernel,
        out_shape=jax.ShapeDtypeStruct(xr.shape, x.dtype),
        grid=(B, C // ct),
        in_specs=[
            pl.BlockSpec((None, ct, A, L), lambda b, c: (b, c, 0, 0)),
            pl.BlockSpec(memory_space=pltpu.MemorySpace.SMEM),
            pl.BlockSpec(memory_space=pltpu.MemorySpace.SMEM),
        ],
        out_specs=pl.BlockSpec((None, ct, A, L), lambda b, c: (b, c, 0, 0)),
        scratch_shapes=[pltpu.VMEM((Ap, Lp), jnp.float32)],
        compiler_params=pltpu.CompilerParams(
            dimension_semantics=("parallel", "parallel"),
            vmem_limit_bytes=vmem_limit),
        cost_estimate=cost,
    )(xr, wr, sf)
    return out.reshape(x.shape)


# --------------------------------------------------------------------------- #
# Plain-JAX reference (correctness check)
# --------------------------------------------------------------------------- #
def _reference_dynamic(x, w, sf):
    B, C, A, E, T = x.shape
    Kh, Kw = w.shape[1], w.shape[2]
    p1, p2 = (Kh - 1) // 2, (Kw - 1) // 2
    xp = jnp.pad(jnp.abs(x), ((0, 0), (0, 0), (p1, p1), (p2, p2), (0, 0)))
    conv = jnp.zeros_like(x)
    for i in range(Kh):
        for j in range(Kw):
            conv = conv + (w[:, i, j][None, :, None, None, None]
                           * xp[:, :, i:i + A, j:j + E, :])
    nf = conv + sf
    return jnp.tanh(x / nf)


if __name__ == "__main__":
    key = jax.random.PRNGKey(0)
    B, C, A, E, T = 2, 4, 8, 8, 16   # batch, channels, azimuth, elevation, time
    Kh, Kw = 3, 3                    # NormalizationBlock(shape=(3, 3, ...), c_in=C)

    x = jax.random.normal(key, (B, C, A, E, T), jnp.float32)

    # Deterministic parameter init, exactly as the PyTorch __init__ does:
    spatial_w = jnp.full((C, Kh, Kw), 1e-4, jnp.float32)  # layer_spatial.weight.fill_(0.0001)
    squeeze_factor = 1.0                                  # nn.Parameter([1.0])
    # layer_rf.layer_temporal.weight is fixed at 1.0 (1x1x1 depthwise) -> identity, folded.

    fwd_dyn = jax.jit(functools.partial(normalization_block_forward, mode="dynamic"))
    fwd_sta = jax.jit(functools.partial(normalization_block_forward, mode="static"))
    fwd_non = jax.jit(functools.partial(normalization_block_forward, mode="none"))

    out_dyn = jax.block_until_ready(
        fwd_dyn(x, spatial_weight=spatial_w, squeeze_factor=squeeze_factor))
    out_sta = jax.block_until_ready(fwd_sta(x, squeeze_factor=squeeze_factor))
    out_non = jax.block_until_ready(fwd_non(x))

    # Correctness vs plain-JAX references.  Dynamic mode uses an EUP approximate
    # reciprocal + one Newton step, so it matches exact division closely.
    ref_dyn = _reference_dynamic(x, spatial_w, squeeze_factor)
    assert jnp.allclose(out_dyn, ref_dyn, atol=2e-4, rtol=0.0), \
        float(jnp.max(jnp.abs(out_dyn - ref_dyn)))
    assert jnp.allclose(out_sta, jnp.tanh(x / squeeze_factor), atol=1e-5, rtol=1e-5)
    assert jnp.allclose(out_non, x)

    print("KERNEL_OK")
</pallas_src>

<mosaic_0001>
module attributes {stable_mosaic.version = 11 : i64} {
  func.func @_dynamic_norm_kernel(%arg0: i32, %arg1: i32, %arg2: memref<1x2x8x128xf32, #tpu.memory_space<vmem>>, %arg3: memref<36xf32, #tpu.memory_space<smem>>, %arg4: memref<1xf32, #tpu.memory_space<smem>>, %arg5: memref<1x2x8x128xf32, #tpu.memory_space<vmem>>, %arg6: memref<10x160xf32, #tpu.memory_space<vmem>>) attributes {dimension_semantics = [#tpu.dimension_semantics<parallel>, #tpu.dimension_semantics<parallel>], iteration_bounds = array<i64: 2, 2>, scalar_prefetch = 0 : i64, scratch_operands = 1 : i64, tpu.core_type = #tpu.core_type<tc>, window_params = [{transform_indices = @transform_0, window_bounds = array<i64: 1, 2, 8, 128>}, {transform_indices = @transform_1, window_bounds = array<i64: 36>}, {transform_indices = @transform_2, window_bounds = array<i64: 1>}, {transform_indices = @transform_3, window_bounds = array<i64: 1, 2, 8, 128>}]} {
    %c0 = arith.constant 0 : index
    %0 = memref.load %arg4[%c0] : memref<1xf32, #tpu.memory_space<smem>>
    %c2_i32 = arith.constant 2 : i32
    %1 = arith.muli %arg1, %c2_i32 : i32
    %cst = arith.constant 0.000000e+00 : f32
    %2 = vector.broadcast %cst : f32 to vector<1x160xf32>
    %c0_0 = arith.constant 0 : index
    %c0_1 = arith.constant 0 : index
    %3 = vector.load %arg6[%c0_0, %c0_1] : memref<10x160xf32, #tpu.memory_space<vmem>>, vector<1x160xf32>
    tpu.vector_store %arg6[%c0_0, %c0_1], %2 {strides = array<i32>} : memref<10x160xf32, #tpu.memory_space<vmem>>, vector<1x160xf32>,
    %cst_2 = arith.constant 0.000000e+00 : f32
    %4 = vector.broadcast %cst_2 : f32 to vector<1x160xf32>
    %c9 = arith.constant 9 : index
    %c0_3 = arith.constant 0 : index
    %5 = vector.load %arg6[%c9, %c0_3] : memref<10x160xf32, #tpu.memory_space<vmem>>, vector<1x160xf32>
    tpu.vector_store %arg6[%c9, %c0_3], %4 {strides = array<i32>} : memref<10x160xf32, #tpu.memory_space<vmem>>, vector<1x160xf32>,
    %cst_4 = arith.constant 0.000000e+00 : f32
    %6 = vector.broadcast %cst_4 : f32 to vector<10x16xf32>
    %c0_5 = arith.constant 0 : index
    %c0_6 = arith.constant 0 : index
    %7 = vector.load %arg6[%c0_5, %c0_6] : memref<10x160xf32, #tpu.memory_space<vmem>>, vector<10x16xf32>
    tpu.vector_store %arg6[%c0_5, %c0_6], %6 {strides = array<i32>} : memref<10x160xf32, #tpu.memory_space<vmem>>, vector<10x16xf32>,
    %cst_7 = arith.constant 0.000000e+00 : f32
    %8 = vector.broadcast %cst_7 : f32 to vector<10x16xf32>
    %c0_8 = arith.constant 0 : index
    %c144 = arith.constant 144 : index
    %9 = vector.load %arg6[%c0_8, %c144] : memref<10x160xf32, #tpu.memory_space<vmem>>, vector<10x16xf32>
    tpu.vector_store %arg6[%c0_8, %c144], %8 {strides = array<i32>} : memref<10x160xf32, #tpu.memory_space<vmem>>, vector<10x16xf32>,
    %c0_i32 = arith.constant 0 : i32
    %c0_9 = arith.constant 0 : index
    %10 = arith.index_cast %c0_i32 : i32 to index
    %c0_10 = arith.constant 0 : index
    %c0_11 = arith.constant 0 : index
    %11 = vector.load %arg2[%c0_9, %10, %c0_10, %c0_11] : memref<1x2x8x128xf32, #tpu.memory_space<vmem>>, vector<1x1x8x128xf32>
    %12 = vector.shape_cast %11 : vector<1x1x8x128xf32> to vector<8x128xf32>
    %13 = math.absf %12 : vector<8x128xf32>
    %c1 = arith.constant 1 : index
    %c16 = arith.constant 16 : index
    %14 = vector.load %arg6[%c1, %c16] : memref<10x160xf32, #tpu.memory_space<vmem>>, vector<8x128xf32>
    tpu.vector_store %arg6[%c1, %c16], %13 {strides = array<i32>} : memref<10x160xf32, #tpu.memory_space<vmem>>, vector<8x128xf32>,
    %15 = arith.addi %1, %c0_i32 : i32
    %c9_i32 = arith.constant 9 : i32
    %16 = arith.muli %15, %c9_i32 : i32
    %c0_12 = arith.constant 0 : index
    %c0_13 = arith.constant 0 : index
    %17 = vector.load %arg6[%c0_12, %c0_13] : memref<10x160xf32, #tpu.memory_space<vmem>>, vector<10x128xf32>
    %c0_i32_14 = arith.constant 0 : i32
    %18 = arith.addi %16, %c0_i32_14 : i32
    %c0_i32_15 = arith.constant 0 : i32
    %19 = arith.addi %18, %c0_i32_15 : i32
    %20 = arith.index_cast %19 : i32 to index
    %21 = memref.load %arg3[%20] : memref<36xf32, #tpu.memory_space<smem>>
    %22 = vector.extract_strided_slice %17 {offsets = [0, 0], sizes = [8, 128], strides = [1, 1]} : vector<10x128xf32> to vector<8x128xf32>
    %23 = vector.broadcast %21 : f32 to vector<8x128xf32>
    %24 = arith.mulf %22, %23 : vector<8x128xf32>
    %c3_i32 = arith.constant 3 : i32
    %25 = arith.addi %16, %c3_i32 : i32
    %c0_i32_16 = arith.constant 0 : i32
    %26 = arith.addi %25, %c0_i32_16 : i32
    %27 = arith.index_cast %26 : i32 to index
    %28 = memref.load %arg3[%27] : memref<36xf32, #tpu.memory_space<smem>>
    %29 = vector.extract_strided_slice %17 {offsets = [1, 0], sizes = [8, 128], strides = [1, 1]} : vector<10x128xf32> to vector<8x128xf32>
    %30 = vector.broadcast %28 : f32 to vector<8x128xf32>
    %31 = arith.mulf %29, %30 : vector<8x128xf32>
    %32 = arith.addf %24, %31 : vector<8x128xf32>
    %c6_i32 = arith.constant 6 : i32
    %33 = arith.addi %16, %c6_i32 : i32
    %c0_i32_17 = arith.constant 0 : i32
    %34 = arith.addi %33, %c0_i32_17 : i32
    %35 = arith.index_cast %34 : i32 to index
    %36 = memref.load %arg3[%35] : memref<36xf32, #tpu.memory_space<smem>>
    %37 = vector.extract_strided_slice %17 {offsets = [2, 0], sizes = [8, 128], strides = [1, 1]} : vector<10x128xf32> to vector<8x128xf32>
    %38 = vector.broadcast %36 : f32 to vector<8x128xf32>
    %39 = arith.mulf %37, %38 : vector<8x128xf32>
    %40 = arith.addf %32, %39 : vector<8x128xf32>
    %c0_18 = arith.constant 0 : index
    %c16_19 = arith.constant 16 : index
    %41 = vector.load %arg6[%c0_18, %c16_19] : memref<10x160xf32, #tpu.memory_space<vmem>>, vector<10x128xf32>
    %c0_i32_20 = arith.constant 0 : i32
    %42 = arith.addi %16, %c0_i32_20 : i32
    %c1_i32 = arith.constant 1 : i32
    %43 = arith.addi %42, %c1_i32 : i32
    %44 = arith.index_cast %43 : i32 to index
    %45 = memref.load %arg3[%44] : memref<36xf32, #tpu.memory_space<smem>>
    %46 = vector.extract_strided_slice %41 {offsets = [0, 0], sizes = [8, 128], strides = [1, 1]} : vector<10x128xf32> to vector<8x128xf32>
    %47 = vector.broadcast %45 : f32 to vector<8x128xf32>
    %48 = arith.mulf %46, %47 : vector<8x128xf32>
    %49 = arith.addf %40, %48 : vector<8x128xf32>
    %c3_i32_21 = arith.constant 3 : i32
    %50 = arith.addi %16, %c3_i32_21 : i32
    %c1_i32_22 = arith.constant 1 : i32
    %51 = arith.addi %50, %c1_i32_22 : i32
    %52 = arith.index_cast %51 : i32 to index
    %53 = memref.load %arg3[%52] : memref<36xf32, #tpu.memory_space<smem>>
    %54 = vector.extract_strided_slice %41 {offsets = [1, 0], sizes = [8, 128], strides = [1, 1]} : vector<10x128xf32> to vector<8x128xf32>
    %55 = vector.broadcast %53 : f32 to vector<8x128xf32>
    %56 = arith.mulf %54, %55 : vector<8x128xf32>
    %57 = arith.addf %49, %56 : vector<8x128xf32>
    %c6_i32_23 = arith.constant 6 : i32
    %58 = arith.addi %16, %c6_i32_23 : i32
    %c1_i32_24 = arith.constant 1 : i32
    %59 = arith.addi %58, %c1_i32_24 : i32
    %60 = arith.index_cast %59 : i32 to index
    %61 = memref.load %arg3[%60] : memref<36xf32, #tpu.memory_space<smem>>
    %62 = vector.extract_strided_slice %41 {offsets = [2, 0], sizes = [8, 128], strides = [1, 1]} : vector<10x128xf32> to vector<8x128xf32>
    %63 = vector.broadcast %61 : f32 to vector<8x128xf32>
    %64 = arith.mulf %62, %63 : vector<8x128xf32>
    %65 = arith.addf %57, %64 : vector<8x128xf32>
    %c0_25 = arith.constant 0 : index
    %c32 = arith.constant 32 : index
    %66 = vector.load %arg6[%c0_25, %c32] : memref<10x160xf32, #tpu.memory_space<vmem>>, vector<10x128xf32>
    %c0_i32_26 = arith.constant 0 : i32
    %67 = arith.addi %16, %c0_i32_26 : i32
    %c2_i32_27 = arith.constant 2 : i32
    %68 = arith.addi %67, %c2_i32_27 : i32
    %69 = arith.index_cast %68 : i32 to index
    %70 = memref.load %arg3[%69] : memref<36xf32, #tpu.memory_space<smem>>
    %71 = vector.extract_strided_slice %66 {offsets = [0, 0], sizes = [8, 128], strides = [1, 1]} : vector<10x128xf32> to vector<8x128xf32>
    %72 = vector.broadcast %70 : f32 to vector<8x128xf32>
    %73 = arith.mulf %71, %72 : vector<8x128xf32>
    %74 = arith.addf %65, %73 : vector<8x128xf32>
    %c3_i32_28 = arith.constant 3 : i32
    %75 = arith.addi %16, %c3_i32_28 : i32
    %c2_i32_29 = arith.constant 2 : i32
    %76 = arith.addi %75, %c2_i32_29 : i32
    %77 = arith.index_cast %76 : i32 to index
    %78 = memref.load %arg3[%77] : memref<36xf32, #tpu.memory_space<smem>>
    %79 = vector.extract_strided_slice %66 {offsets = [1, 0], sizes = [8, 128], strides = [1, 1]} : vector<10x128xf32> to vector<8x128xf32>
    %80 = vector.broadcast %78 : f32 to vector<8x128xf32>
    %81 = arith.mulf %79, %80 : vector<8x128xf32>
    %82 = arith.addf %74, %81 : vector<8x128xf32>
    %c6_i32_30 = arith.constant 6 : i32
    %83 = arith.addi %16, %c6_i32_30 : i32
    %c2_i32_31 = arith.constant 2 : i32
    %84 = arith.addi %83, %c2_i32_31 : i32
    %85 = arith.index_cast %84 : i32 to index
    %86 = memref.load %arg3[%85] : memref<36xf32, #tpu.memory_space<smem>>
    %87 = vector.extract_strided_slice %66 {offsets = [2, 0], sizes = [8, 128], strides = [1, 1]} : vector<10x128xf32> to vector<8x128xf32>
    %88 = vector.broadcast %86 : f32 to vector<8x128xf32>
    %89 = arith.mulf %87, %88 : vector<8x128xf32>
    %90 = arith.addf %82, %89 : vector<8x128xf32>
    %91 = vector.broadcast %0 : f32 to vector<8x128xf32>
    %92 = arith.addf %90, %91 : vector<8x128xf32>
    %93 = tpu.reciprocal %92 {approx = true} : vector<8x128xf32> -> vector<8x128xf32>
    %94 = arith.mulf %92, %93 : vector<8x128xf32>
    %cst_32 = arith.constant 2.000000e+00 : f32
    %95 = vector.broadcast %cst_32 : f32 to vector<8x128xf32>
    %96 = arith.subf %95, %94 : vector<8x128xf32>
    %97 = arith.mulf %93, %96 : vector<8x128xf32>
    %98 = arith.mulf %12, %97 : vector<8x128xf32>
    %99 = math.tanh %98 : vector<8x128xf32>
    %c0_33 = arith.constant 0 : index
    %100 = arith.index_cast %c0_i32 : i32 to index
    %c0_34 = arith.constant 0 : index
    %c0_35 = arith.constant 0 : index
    %101 = vector.load %arg5[%c0_33, %100, %c0_34, %c0_35] : memref<1x2x8x128xf32, #tpu.memory_space<vmem>>, vector<1x1x8x128xf32>
    %102 = vector.shape_cast %101 : vector<1x1x8x128xf32> to vector<8x128xf32>
    %103 = vector.shape_cast %99 : vector<8x128xf32> to vector<1x1x8x128xf32>
    tpu.vector_store %arg5[%c0_33, %100, %c0_34, %c0_35], %103 {strides = array<i32>} : memref<1x2x8x128xf32, #tpu.memory_space<vmem>>, vector<1x1x8x128xf32>,
    %c1_i32_36 = arith.constant 1 : i32
    %c0_37 = arith.constant 0 : index
    %104 = arith.index_cast %c1_i32_36 : i32 to index
    %c0_38 = arith.constant 0 : index
    %c0_39 = arith.constant 0 : index
    %105 = vector.load %arg2[%c0_37, %104, %c0_38, %c0_39] : memref<1x2x8x128xf32, #tpu.memory_space<vmem>>, vector<1x1x8x128xf32>
    %106 = vector.shape_cast %105 : vector<1x1x8x128xf32> to vector<8x128xf32>
    %107 = math.absf %106 : vector<8x128xf32>
    %c1_40 = arith.constant 1 : index
    %c16_41 = arith.constant 16 : index
    %108 = vector.load %arg6[%c1_40, %c16_41] : memref<10x160xf32, #tpu.memory_space<vmem>>, vector<8x128xf32>
    tpu.vector_store %arg6[%c1_40, %c16_41], %107 {strides = array<i32>} : memref<10x160xf32, #tpu.memory_space<vmem>>, vector<8x128xf32>,
    %109 = arith.addi %1, %c1_i32_36 : i32
    %c9_i32_42 = arith.constant 9 : i32
    %110 = arith.muli %109, %c9_i32_42 : i32
    %c0_43 = arith.constant 0 : index
    %c0_44 = arith.constant 0 : index
    %111 = vector.load %arg6[%c0_43, %c0_44] : memref<10x160xf32, #tpu.memory_space<vmem>>, vector<10x128xf32>
    %c0_i32_45 = arith.constant 0 : i32
    %112 = arith.addi %110, %c0_i32_45 : i32
    %c0_i32_46 = arith.constant 0 : i32
    %113 = arith.addi %112, %c0_i32_46 : i32
    %114 = arith.index_cast %113 : i32 to index
    %115 = memref.load %arg3[%114] : memref<36xf32, #tpu.memory_space<smem>>
    %116 = vector.extract_strided_slice %111 {offsets = [0, 0], sizes = [8, 128], strides = [1, 1]} : vector<10x128xf32> to vector<8x128xf32>
    %117 = vector.broadcast %115 : f32 to vector<8x128xf32>
    %118 = arith.mulf %116, %117 : vector<8x128xf32>
    %c3_i32_47 = arith.constant 3 : i32
    %119 = arith.addi %110, %c3_i32_47 : i32
    %c0_i32_48 = arith.constant 0 : i32
    %120 = arith.addi %119, %c0_i32_48 : i32
    %121 = arith.index_cast %120 : i32 to index
    %122 = memref.load %arg3[%121] : memref<36xf32, #tpu.memory_space<smem>>
    %123 = vector.extract_strided_slice %111 {offsets = [1, 0], sizes = [8, 128], strides = [1, 1]} : vector<10x128xf32> to vector<8x128xf32>
    %124 = vector.broadcast %122 : f32 to vector<8x128xf32>
    %125 = arith.mulf %123, %124 : vector<8x128xf32>
    %126 = arith.addf %118, %125 : vector<8x128xf32>
    %c6_i32_49 = arith.constant 6 : i32
    %127 = arith.addi %110, %c6_i32_49 : i32
    %c0_i32_50 = arith.constant 0 : i32
    %128 = arith.addi %127, %c0_i32_50 : i32
    %129 = arith.index_cast %128 : i32 to index
    %130 = memref.load %arg3[%129] : memref<36xf32, #tpu.memory_space<smem>>
    %131 = vector.extract_strided_slice %111 {offsets = [2, 0], sizes = [8, 128], strides = [1, 1]} : vector<10x128xf32> to vector<8x128xf32>
    %132 = vector.broadcast %130 : f32 to vector<8x128xf32>
    %133 = arith.mulf %131, %132 : vector<8x128xf32>
    %134 = arith.addf %126, %133 : vector<8x128xf32>
    %c0_51 = arith.constant 0 : index
    %c16_52 = arith.constant 16 : index
    %135 = vector.load %arg6[%c0_51, %c16_52] : memref<10x160xf32, #tpu.memory_space<vmem>>, vector<10x128xf32>
    %c0_i32_53 = arith.constant 0 : i32
    %136 = arith.addi %110, %c0_i32_53 : i32
    %c1_i32_54 = arith.constant 1 : i32
    %137 = arith.addi %136, %c1_i32_54 : i32
    %138 = arith.index_cast %137 : i32 to index
    %139 = memref.load %arg3[%138] : memref<36xf32, #tpu.memory_space<smem>>
    %140 = vector.extract_strided_slice %135 {offsets = [0, 0], sizes = [8, 128], strides = [1, 1]} : vector<10x128xf32> to vector<8x128xf32>
    %141 = vector.broadcast %139 : f32 to vector<8x128xf32>
    %142 = arith.mulf %140, %141 : vector<8x128xf32>
    %143 = arith.addf %134, %142 : vector<8x128xf32>
    %c3_i32_55 = arith.constant 3 : i32
    %144 = arith.addi %110, %c3_i32_55 : i32
    %c1_i32_56 = arith.constant 1 : i32
    %145 = arith.addi %144, %c1_i32_56 : i32
    %146 = arith.index_cast %145 : i32 to index
    %147 = memref.load %arg3[%146] : memref<36xf32, #tpu.memory_space<smem>>
    %148 = vector.extract_strided_slice %135 {offsets = [1, 0], sizes = [8, 128], strides = [1, 1]} : vector<10x128xf32> to vector<8x128xf32>
    %149 = vector.broadcast %147 : f32 to vector<8x128xf32>
    %150 = arith.mulf %148, %149 : vector<8x128xf32>
    %151 = arith.addf %143, %150 : vector<8x128xf32>
    %c6_i32_57 = arith.constant 6 : i32
    %152 = arith.addi %110, %c6_i32_57 : i32
    %c1_i32_58 = arith.constant 1 : i32
    %153 = arith.addi %152, %c1_i32_58 : i32
    %154 = arith.index_cast %153 : i32 to index
    %155 = memref.load %arg3[%154] : memref<36xf32, #tpu.memory_space<smem>>
    %156 = vector.extract_strided_slice %135 {offsets = [2, 0], sizes = [8, 128], strides = [1, 1]} : vector<10x128xf32> to vector<8x128xf32>
    %157 = vector.broadcast %155 : f32 to vector<8x128xf32>
    %158 = arith.mulf %156, %157 : vector<8x128xf32>
    %159 = arith.addf %151, %158 : vector<8x128xf32>
    %c0_59 = arith.constant 0 : index
    %c32_60 = arith.constant 32 : index
    %160 = vector.load %arg6[%c0_59, %c32_60] : memref<10x160xf32, #tpu.memory_space<vmem>>, vector<10x128xf32>
    %c0_i32_61 = arith.constant 0 : i32
    %161 = arith.addi %110, %c0_i32_61 : i32
    %c2_i32_62 = arith.constant 2 : i32
    %162 = arith.addi %161, %c2_i32_62 : i32
    %163 = arith.index_cast %162 : i32 to index
    %164 = memref.load %arg3[%163] : memref<36xf32, #tpu.memory_space<smem>>
    %165 = vector.extract_strided_slice %160 {offsets = [0, 0], sizes = [8, 128], strides = [1, 1]} : vector<10x128xf32> to vector<8x128xf32>
    %166 = vector.broadcast %164 : f32 to vector<8x128xf32>
    %167 = arith.mulf %165, %166 : vector<8x128xf32>
    %168 = arith.addf %159, %167 : vector<8x128xf32>
    %c3_i32_63 = arith.constant 3 : i32
    %169 = arith.addi %110, %c3_i32_63 : i32
    %c2_i32_64 = arith.constant 2 : i32
    %170 = arith.addi %169, %c2_i32_64 : i32
    %171 = arith.index_cast %170 : i32 to index
    %172 = memref.load %arg3[%171] : memref<36xf32, #tpu.memory_space<smem>>
    %173 = vector.extract_strided_slice %160 {offsets = [1, 0], sizes = [8, 128], strides = [1, 1]} : vector<10x128xf32> to vector<8x128xf32>
    %174 = vector.broadcast %172 : f32 to vector<8x128xf32>
    %175 = arith.mulf %173, %174 : vector<8x128xf32>
    %176 = arith.addf %168, %175 : vector<8x128xf32>
    %c6_i32_65 = arith.constant 6 : i32
    %177 = arith.addi %110, %c6_i32_65 : i32
    %c2_i32_66 = arith.constant 2 : i32
    %178 = arith.addi %177, %c2_i32_66 : i32
    %179 = arith.index_cast %178 : i32 to index
    %180 = memref.load %arg3[%179] : memref<36xf32, #tpu.memory_space<smem>>
    %181 = vector.extract_strided_slice %160 {offsets = [2, 0], sizes = [8, 128], strides = [1, 1]} : vector<10x128xf32> to vector<8x128xf32>
    %182 = vector.broadcast %180 : f32 to vector<8x128xf32>
    %183 = arith.mulf %181, %182 : vector<8x128xf32>
    %184 = arith.addf %176, %183 : vector<8x128xf32>
    %185 = vector.broadcast %0 : f32 to vector<8x128xf32>
    %186 = arith.addf %184, %185 : vector<8x128xf32>
    %187 = tpu.reciprocal %186 {approx = true} : vector<8x128xf32> -> vector<8x128xf32>
    %188 = arith.mulf %186, %187 : vector<8x128xf32>
    %cst_67 = arith.constant 2.000000e+00 : f32
    %189 = vector.broadcast %cst_67 : f32 to vector<8x128xf32>
    %190 = arith.subf %189, %188 : vector<8x128xf32>
    %191 = arith.mulf %187, %190 : vector<8x128xf32>
    %192 = arith.mulf %106, %191 : vector<8x128xf32>
    %193 = math.tanh %192 : vector<8x128xf32>
    %c0_68 = arith.constant 0 : index
    %194 = arith.index_cast %c1_i32_36 : i32 to index
    %c0_69 = arith.constant 0 : index
    %c0_70 = arith.constant 0 : index
    %195 = vector.load %arg5[%c0_68, %194, %c0_69, %c0_70] : memref<1x2x8x128xf32, #tpu.memory_space<vmem>>, vector<1x1x8x128xf32>
    %196 = vector.shape_cast %195 : vector<1x1x8x128xf32> to vector<8x128xf32>
    %197 = vector.shape_cast %193 : vector<8x128xf32> to vector<1x1x8x128xf32>
    tpu.vector_store %arg5[%c0_68, %194, %c0_69, %c0_70], %197 {strides = array<i32>} : memref<1x2x8x128xf32, #tpu.memory_space<vmem>>, vector<1x1x8x128xf32>,
    %c2_i32_71 = arith.constant 2 : i32
    return
  }
  func.func @transform_0(%arg0: i32, %arg1: i32) -> (i32, i32, i32, i32) {
    %c0_i32 = arith.constant 0 : i32
    %c0_i32_0 = arith.constant 0 : i32
    %c0_i32_1 = arith.constant 0 : i32
    return %arg0, %arg1, %c0_i32, %c0_i32_0 : i32, i32, i32, i32
  }
  func.func @transform_1(%arg0: i32, %arg1: i32) -> i32 {
    %c0_i32 = arith.constant 0 : i32
    %c0_i32_0 = arith.constant 0 : i32
    return %c0_i32 : i32
  }
  func.func @transform_2(%arg0: i32, %arg1: i32) -> i32 {
    %c0_i32 = arith.constant 0 : i32
    %c0_i32_0 = arith.constant 0 : i32
    return %c0_i32 : i32
  }
  func.func @transform_3(%arg0: i32, %arg1: i32) -> (i32, i32, i32, i32) {
    %c0_i32 = arith.constant 0 : i32
    %c0_i32_0 = arith.constant 0 : i32
    %c0_i32_1 = arith.constant 0 : i32
    return %arg0, %arg1, %c0_i32, %c0_i32_0 : i32, i32, i32, i32
  }
}

</mosaic_0001>

<bundles_post_ra>
// kernel: normalization_block_forward.1
= control target key start
LH: loop header
LB: loop body
LE: loop exit
PB: predicated region body
PF: predicated region fallthrough
CT: control target
= control target key end

     0   :  { %s1194_s0 = inlined_call_operand.vmem [shape: f32[2,4,8,128], index: 0, kind: input, shape index: {}]   ;;  %s1195_s1 = inlined_call_operand.vmem [shape: f32[36], index: 1, kind: input, shape index: {}]   ;;  %s1196_s2 = inlined_call_operand.<no memory space> [shape: f32[1], index: 2, kind: input, shape index: {}]   ;;  %s1197_s3 = inlined_call_operand.vmem [shape: f32[2,4,8,128], index: 3, kind: output, shape index: {}]  }
   0x1   :  { %8 = sst [smem:[#allocation3]] %s1196_s2 }
   0x2   :  { %9 = vsyncpa [#allocation5], 0  ;;  %s880_s14 = smov 0   ;;  %s882_s15 = smov 0  }
   0x3   :  { %s884_s16 = smov 0   ;;  %s886_s17 = smov 0  }
   0x4   :  { %s888_s18 = smov 0  }
   0x5 LB: > { %s712_s2 = sadd.s32 4294967295, %s850_s18   ;;  %s24_s19 = sadd.s32 1, %s842_s16  ;;  %s850_s18 = sphi %s888_s18, %s15_s18   ;;  %s846_s17 = sphi %s886_s17, %s1203_s17   ;;  %s842_s16 = sphi %s884_s16, %s1202_s16   ;;  %s838_s15 = sphi %s882_s15, %s1201_s15   ;;  %s834_s14 = sphi %s880_s14, %s1200_s14  }
   0x6   : > { %p25_p0 = scmp.ge.s32.totalorder %s24_s19, 2  ;;  %s27_s20 = sadd.s32 1, %s846_s17 }
   0x7   : > { %p714_p1 = scmp.ge.s32.totalorder %s850_s18, 1  ;;  %p130_p2 = scmp.lt.s32.totalorder %s850_s18, 5 }
   0x8   : > { %s1205_s19 = smov (%p25_p0, %s24_s19), 0  ;;  %s1207_s20 = smov (!%p25_p0, %s27_s20), %s846_s17 }
   0x9   : > { %p913_p3 = pnand %p714_p1, %p130_p2  ;;  %p29_p4 = scmp.ge.s32.totalorder %s1207_s20, 2 }
   0xa   : > { %p917_p5 = scmp.eq.s32.totalorder %s712_s2, 0  ;;  %s143_s25 = sshll.u32 %s1195_s1, 4  ;;  %s144_s25 = int_to_ptr.vmem [resolvable:$true] %s143_s25 }
   0xb   : > { %p734_p6 = pneg %p913_p3  ;;  %s1209_s20 = smov (%p29_p4, %s1207_s20), 0 }
   0xc   : > { %s793_s26 = scalar_lea.vmem %s144_s25, 16  ;;  %p801_p12 = scmp.lt.s32.totalorder %s144_s25, %s144_s25 }
   0xd   : > { %p735_p7 = pnand %p917_p5, %p734_p6  ;;  %p794_p8 = scmp.ne.s32.totalorder %s144_s25, %s793_s26 }
   0xe   : > { %p802_p13 = scmp.lt.s32.totalorder %s793_s26, %s793_s26 }
   0xf   : > { %p795_p9 = pneg %p735_p7 }
  0x10   : > { %p803_p0 = por %p802_p13, %p801_p12 }
  0x11   : > { %p796_p10 = pnand %p795_p9, %p794_p8 }
  0x13   : > { %p797_p11 = pneg %p796_p10 }
  0x15   : > { %p804_p1 = pnand %p803_p0, %p797_p11 }
  0x17   : > { %807 = shalt.err (!%p804_p1)
}
  0x18   : > { %s852_s27 = smov [#allocation4]   ;;  %172 = sbr.rel (%p913_p3) target bundleno = 371 (0x173), region = 32 }
  0x19   : > { %737 = dma.vmem_to_smem (!%p735_p7), %s144_s25, 16, %s852_s27, [#allocation5]  }
  0x1f   : > { %829 = dma.done.wait (%p917_p5), [#allocation5], 16  }
  0x20   : > { %831 = vsyncadd (%p917_p5), [#allocation5], 4294967280 }
  0x21   : > { %178 = sfence }
  0x22   : > { %s937_s28 = sshll.u32 %s834_s14, 1  ;;  %p206_p2 = scmp.lt.s32.totalorder %s838_s15, 1  ;;  %v227_v0 = vlaneseq  ;;  %vm236_vm0 = vcmask 130048   ;;  %vm238_vm1 = vcmask 123904   ;;  %vm240_vm2 = vcmask 261248  }
  0x23   : > { %p208_p4 = scmp.lt.s32.totalorder %s937_s28, 3  ;;  %vm242_vm3 = vcmask 255104   ;;  %v853_v1 = vmov 0.0   ;;  %s854_s9 = smov 16   ;;  %vm251_vm5 = vcmask 1047681   ;;  %vm253_vm6 = vcmask 130049  }
  0x24   : > { %s1211_s15 = smov (!%p206_p2, %s838_s15), 1  ;;  %vm229_vm4 = vcmp.lt.s32.totalorder %v227_v0, 160  ;;  %s958_s10 = smul.u32 18, %s834_s14  ;;  %vm255_vm7 = vcmask 1040512   ;;  %vm257_vm8 = vcmask 122880   ;;  %vm272_vm9 = vcmask 1046528  }
  0x25   : > { %s209_s29 = scalar_select %p208_p4, %s937_s28, 3  ;;  %231 = vst.msk [vmem:[#allocation2] ss:$8 sm:$0x3] %vm229_vm4, %v853_v1  ;;  %vm285_vm10 = vcmask 1045504   ;;  %vm306_vm11 = vcmask 916480  }
  0x26   : > { %234 = vst.msk [vmem:[#allocation2 + $0x11] ss:$8 sm:$0x3] %vm229_vm4, %v853_v1  ;;  %s720_s30 = sshll.u32 %s1211_s15, 2  ;;  %s358_s11 = sadd.s32 2, %s958_s10  ;;  %vm369_vm12 = vcmask 785408  }
  0x27   : > { %237 = vst.msk [vmem:[#allocation2] sm:$0xff] %vm236_vm0, %v853_v1  ;;  %s943_s4 = sadd.s32 %s720_s30, %s209_s29  ;;  %s295_s12 = sadd.s32 1, %s958_s10 }
  0x28   : > { %239 = vst.msk [vmem:[#allocation2 + $0x10] sm:$0x3] %vm238_vm1, %v853_v1  ;;  %s721_s5 = sshll.u32 %s943_s4, 3  ;;  %s310_s13 = sadd.s32 4, %s958_s10 }
  0x29   : > { %241 = vst.msk [vmem:[#allocation2 + $0x8] sm:$0xff] %vm240_vm2, %v853_v1  ;;  %s213_s8 = scalar_lea.vmem %s1194_s0, %s721_s5  ;;  %s334_s15 = sadd.s32 7, %s958_s10 }
  0x2a   : > { %243 = vst.msk [vmem:[#allocation2 + $0x18] sm:$0x3] %vm242_vm3, %v853_v1  ;;  %v951_v2 = vld [vmem:[%s213_s8] sm:$0xff]  ;;  %v953_v3 = vld [vmem:[%s213_s8 + $0x8] sm:$0xff]  ;;  %s964_s2 = sld [smem:[#allocation4 + %s358_s11]]  ;;  %s373_s22 = sadd.s32 5, %s958_s10 }
  0x2b   : > { %v245_v4 = vand.u32 2147483647, %v951_v2  ;;  %v432_v5 = vand.u32 2147483647, %v953_v3  ;;  %s966_s21 = sld [smem:[#allocation4 + %s295_s12]]  ;;  %s397_s25 = sadd.s32 8, %s958_s10 }
  0x2c   : > { %s311_s14 = sld [smem:[#allocation4 + %s310_s13]]  ;;  %s442_s26 = sadd.s32 1, %s937_s28 }
  0x2d   : > { %v247_v6 = vrot.slane %v245_v4, 7  ;;  %v434_v7 = vrot.slane %v432_v5, 7  ;;  %s335_s23 = sld [smem:[#allocation4 + %s334_s15]]  ;;  %s979_s29 = smul.u32 9, %s442_s26 }
  0x2e   : > { %s374_s24 = sld [smem:[#allocation4 + %s373_s22]]  ;;  %s265_s28 = sadd.s32 3, %s958_s10 }
  0x2f   : > { %248 = vrot.lane.b32.xlu0 %v247_v6, %s854_s9  ;;  %s975_s27 = sld [smem:[#allocation4 + %s397_s25]]  ;;  %s278_s30 = sadd.s32 6, %s958_s10 }
  0x30   : > { %v360_v9 = vstv %s964_s2  ;;  %s855_s6 = smov 96   ;;  %s856_s7 = smov 112  }
  0x31   : > { %v297_v10 = vstv %s966_s21  ;;  %s477_s8 = sadd.s32 1, %s979_s29  ;;  %s539_s11 = sadd.s32 2, %s979_s29 }
  0x32   : > { %v312_v11 = vstv %s311_s14  ;;  %s491_s12 = sadd.s32 4, %s979_s29  ;;  %s1012_s13 = sld [smem:[#allocation4 + %s265_s28]] }
  0x33   : > { %435 = vrot.lane.b32.xlu0 %v434_v7, %s854_s9  ;;  %v336_v13 = vstv %s335_s23  ;;  %s1003_s9 = sld [smem:[#allocation4 + %s958_s10]]  ;;  %s515_s2 = sadd.s32 7, %s979_s29 }
  0x34   : > { %v375_v22 = vstv %s374_s24  ;;  %s1014_s10 = sld [smem:[#allocation4 + %s278_s30]]  ;;  %s553_s22 = sadd.s32 5, %s979_s29 }
  0x35   : > { %v399_v33 = vstv %s975_s27  ;;  %s1017_s15 = sld [smem:[#allocation4 + %s477_s8]]  ;;  %s449_s23 = sadd.s32 3, %s979_s29 }
  0x36   : > { %s1022_s21 = sld [smem:[#allocation4 + %s539_s11]]  ;;  %s461_s25 = sadd.s32 6, %s979_s29 }
  0x37   : > { %s1024_s14 = sld [smem:[#allocation4 + %s491_s12]]  ;;  %s577_s8 = sadd.s32 8, %s979_s29 }
  0x38   : > { %s1030_s24 = sld [smem:[#allocation4 + %s515_s2]]  ;;  %v267_v63 = vstv %s1012_s13  ;;  %s223_s11 = scalar_lea.vmem %s1197_s3, %s721_s5 }
  0x39   : > { %s1038_s26 = sld [smem:[#allocation4 + %s553_s22]]  ;;  %v263_v58 = vstv %s1003_s9 }
  0x3a   : > { %s1040_s27 = sld [smem:[#allocation4 + %s449_s23]]  ;;  %v280_v0 = vstv %s1014_s10 }
  0x3b   : > { %s1044_s28 = sld [smem:[#allocation4 + %s979_s29]]  ;;  %v479_v60 = vstv %s1017_s15 }
  0x3c   : > { %s1046_s30 = sld [smem:[#allocation4 + %s461_s25]]  ;;  %v541_v61 = vstv %s1022_s21 }
  0x3d   : > { %v493_v57 = vstv %s1024_s14  ;;  %s1095_s29 = sld [smem:[#allocation4 + %s577_s8]] }
  0x3e   : > { %v1067_v6 = vstv %s1030_s24 }
  0xa1   : > { %v249_v8 = vpop.permute.xlu0 %248 }
  0xa2   : > { %252 = vst.msk [vmem:[#allocation2] sm:$0xfe] %vm251_vm5, %v249_v8 }
  0xa3   : > { %254 = vst.msk [vmem:[#allocation2 + $0x8] sm:$0xfe] %vm253_vm6, %v249_v8 }
  0xa4   : > { %256 = vst.msk [vmem:[#allocation2 + $0x10] sm:$0x1] %vm255_vm7, %v249_v8 }
  0xa5   : > { %258 = vst.msk [vmem:[#allocation2 + $0x18] sm:$0x1] %vm257_vm8, %v249_v8  ;;  %v436_v12 = vpop.permute.xlu0 %435 }
  0xa9   : > { %v981_v14 = vld [vmem:[#allocation2] sm:$0xff] }
  0xaa   : > { %v983_v15 = vld [vmem:[#allocation2 + $0x8] sm:$0xff]  ;;  %v361_v17 = vmul.f32 %v360_v9, %v981_v14  ;;  %v298_v18 = vmul.f32 %v297_v10, %v981_v14  ;;  %v313_v19 = vmul.f32 %v312_v11, %v981_v14  ;;  %438 = vst.msk [vmem:[#allocation2] sm:$0xfe] %vm251_vm5, %v436_v12  ;;  %v337_v24 = vmul.f32 %v336_v13, %v981_v14 }
  0xab   : > { %v293_v16 = vld [vmem:[#allocation2 + $0x10] sm:$0x3]  ;;  %439 = vst.msk [vmem:[#allocation2 + $0x8] sm:$0xfe] %vm253_vm6, %v436_v12  ;;  %v376_v28 = vmul.f32 %v375_v22, %v981_v14  ;;  %v299_v30 = vmul.f32 %v297_v10, %v983_v15  ;;  %v314_v31 = vmul.f32 %v312_v11, %v983_v15  ;;  %v400_v39 = vmul.f32 %v399_v33, %v981_v14 }
  0xac   : > { %v988_v20 = vld [vmem:[#allocation2 + $0x10] sm:$0x3]  ;;  %v990_v21 = vld [vmem:[#allocation2 + $0x18] sm:$0x3]  ;;  %v315_v23 = vmul.f32 %v312_v11, %v293_v16  ;;  %v339_v25 = vmul.f32 %v336_v13, %v293_v16  ;;  %365 = vrot.lane.b32.xlu0 %v361_v17, %s855_s6  ;;  %302 = vrot.lane.b32.xlu1 %v298_v18, %s856_s7  ;;  %v321_v26 = vrot.slane %v313_v19, 1  ;;  %v378_v29 = vmul.f32 %v375_v22, %v293_v16 }
  0xad   : > { %440 = vst.msk [vmem:[#allocation2 + $0x10] sm:$0x1] %vm255_vm7, %v436_v12  ;;  %v316_v32 = vmul.f32 %v312_v11, %v990_v21  ;;  %v345_v35 = vrot.slane %v337_v24, 2  ;;  %v384_v37 = vrot.slane %v376_v28, 1  ;;  %v362_v40 = vmul.f32 %v360_v9, %v983_v15 }
  0xae   : > { %441 = vst.msk [vmem:[#allocation2 + $0x18] sm:$0x1] %vm257_vm8, %v436_v12  ;;  %v322_v27 = vrot.slane %v315_v23, 1  ;;  %v346_v36 = vrot.slane %v339_v25, 2  ;;  %v385_v38 = vrot.slane %v378_v29, 1  ;;  %v324_v41 = vrot.slane %v314_v31, 1 }
  0xaf   : > { %v325_v42 = vrot.slane %v316_v32, 1  ;;  %v402_v43 = vmul.f32 %v399_v33, %v293_v16  ;;  %v338_v45 = vmul.f32 %v336_v13, %v983_v15  ;;  %v340_v46 = vmul.f32 %v336_v13, %v990_v21 }
  0xb0   : > { %v323_v34 = vsel %vm272_vm9, %v321_v26, %v322_v27  ;;  %304 = vrot.lane.b32.xlu1 %v299_v30, %s856_s7  ;;  %v347_v44 = vsel %vm285_vm10, %v345_v35, %v346_v36  ;;  %v386_v47 = vsel %vm272_vm9, %v384_v37, %v385_v38  ;;  %v408_v48 = vrot.slane %v400_v39, 2 }
  0xb1   : > { %327 = vrot.lane.b32.xlu0 %v323_v34, %s856_s7  ;;  %v326_v49 = vsel %vm272_vm9, %v324_v41, %v325_v42  ;;  %v409_v50 = vrot.slane %v402_v43, 2  ;;  %v377_v51 = vmul.f32 %v375_v22, %v983_v15  ;;  %v379_v52 = vmul.f32 %v375_v22, %v990_v21  ;;  %v1057_v59 = vld [vmem:[#allocation2] sm:$0xff] }
  0xb2   : > { %v348_v53 = vrot.slane %v338_v45, 2  ;;  %v349_v54 = vrot.slane %v340_v46, 2  ;;  %v401_v55 = vmul.f32 %v399_v33, %v983_v15  ;;  %v403_v56 = vmul.f32 %v399_v33, %v990_v21  ;;  %v1070_v10 = vld [vmem:[#allocation2 + $0x8] sm:$0xff] }
  0xb3   : > { %v410_v1 = vsel %vm285_vm10, %v408_v48, %v409_v50  ;;  %v387_v4 = vrot.slane %v377_v51, 1  ;;  %v388_v5 = vrot.slane %v379_v52, 1  ;;  %v494_v11 = vmul.f32 %v493_v57, %v1057_v59 }
  0xb4   : > { %367 = vrot.lane.b32.xlu1 %v362_v40, %s855_s6  ;;  %v1061_v62 = vld [vmem:[#allocation2 + $0x10] sm:$0x3]  ;;  %v350_v7 = vsel %vm285_vm10, %v348_v53, %v349_v54  ;;  %v411_v8 = vrot.slane %v401_v55, 2  ;;  %v412_v9 = vrot.slane %v403_v56, 2  ;;  %v480_v12 = vmul.f32 %v479_v60, %v1057_v59 }
  0xb5   : > { %351 = vrot.lane.b32.xlu0 %v347_v44, %s856_s7  ;;  %v496_v13 = vmul.f32 %v493_v57, %v1061_v62  ;;  %v1079_v15 = vstv %s1038_s26  ;;  %v451_v16 = vstv %s1040_s27  ;;  %v542_v17 = vmul.f32 %v541_v61, %v1057_v59  ;;  %v1093_v25 = vld [vmem:[#allocation2 + $0x18] sm:$0x3]  ;;  %v445_v31 = vld [vmem:[#allocation2 + $0x10] sm:$0x3] }
  0xb6   : > { %v518_v18 = vmul.f32 %v1067_v6, %v1057_v59  ;;  %v447_v19 = vstv %s1044_s28  ;;  %v463_v21 = vstv %s1046_s30  ;;  %v389_v22 = vsel %vm272_vm9, %v387_v4, %v388_v5 }
  0xb7   : > { %v481_v23 = vmul.f32 %v479_v60, %v1070_v10  ;;  %v520_v24 = vmul.f32 %v1067_v6, %v1061_v62  ;;  %v269_v26 = vmul.f32 %v267_v63, %v988_v20  ;;  %v413_v27 = vsel %vm285_vm10, %v411_v8, %v412_v9 }
  0xb8   : > { %329 = vrot.lane.b32.xlu1 %v326_v49, %s856_s7  ;;  %v502_v28 = vrot.slane %v494_v11, 1  ;;  %v495_v29 = vmul.f32 %v493_v57, %v1070_v10  ;;  %v282_v30 = vmul.f32 %v280_v0, %v988_v20  ;;  %v503_v32 = vrot.slane %v496_v13, 1 }
  0xb9   : > { %390 = vrot.lane.b32.xlu0 %v386_v47, %s855_s6  ;;  %v274_v33 = vrot.slane %v269_v26, 1  ;;  %v264_v34 = vmul.f32 %v981_v14, %v263_v58  ;;  %v268_v35 = vmul.f32 %v981_v14, %v267_v63  ;;  %v526_v36 = vrot.slane %v518_v18, 2 }
  0xba   : > { %v497_v37 = vmul.f32 %v493_v57, %v1093_v25  ;;  %v287_v38 = vrot.slane %v282_v30, 2  ;;  %v281_v39 = vmul.f32 %v981_v14, %v280_v0  ;;  %v453_v41 = vmul.f32 %v451_v16, %v445_v31 }
  0xbb   : > { %v273_v40 = vrot.slane %v268_v35, 1  ;;  %v465_v20 = vmul.f32 %v463_v21, %v445_v31  ;;  %v448_v42 = vmul.f32 %v1057_v59, %v447_v19  ;;  %v527_v43 = vrot.slane %v520_v24, 2 }
  0xbc   : > { %353 = vrot.lane.b32.xlu1 %v350_v7, %s856_s7  ;;  %v286_v44 = vrot.slane %v281_v39, 2  ;;  %v452_v45 = vmul.f32 %v1057_v59, %v451_v16  ;;  %v464_v46 = vmul.f32 %v1057_v59, %v463_v21  ;;  %v504_v47 = vsel %vm272_vm9, %v502_v28, %v503_v32 }
  0xbd   : > { %414 = vrot.lane.b32.xlu0 %v410_v1, %s855_s6  ;;  %v275_v14 = vsel %vm272_vm9, %v273_v40, %v274_v33  ;;  %v457_v48 = vrot.slane %v453_v41, 1  ;;  %v469_v49 = vrot.slane %v465_v20, 2  ;;  %v556_v54 = vmul.f32 %v1079_v15, %v1057_v59 }
  0xbe   : > { %v277_v50 = vadd.f32 %v275_v14, %v264_v34  ;;  %v288_v51 = vsel %vm285_vm10, %v286_v44, %v287_v38  ;;  %v456_v52 = vrot.slane %v452_v45, 1  ;;  %v468_v53 = vrot.slane %v464_v46, 2 }
  0xbf   : > { %v579_v55 = vstv %s1095_s29  ;;  %v558_v56 = vmul.f32 %v1079_v15, %v1061_v62  ;;  %v543_v0 = vmul.f32 %v541_v61, %v1070_v10  ;;  %v528_v1 = vsel %vm285_vm10, %v526_v36, %v527_v43 }
  0xc0   : > { %392 = vrot.lane.b32.xlu1 %v389_v22, %s855_s6  ;;  %v290_v57 = vadd.f32 %v288_v51, %v277_v50  ;;  %v458_v58 = vsel %vm272_vm9, %v456_v52, %v457_v48  ;;  %v470_v60 = vsel %vm285_vm10, %v468_v53, %v469_v49  ;;  %v505_v4 = vrot.slane %v495_v29, 1 }
  0xc1   : > { %484 = vrot.lane.b32.xlu0 %v480_v12, %s856_s7  ;;  %v460_v63 = vadd.f32 %v458_v58, %v448_v42  ;;  %v506_v5 = vrot.slane %v497_v37, 1  ;;  %v519_v7 = vmul.f32 %v1067_v6, %v1070_v10  ;;  %v521_v8 = vmul.f32 %v1067_v6, %v1093_v25 }
  0xc2   : > { %v580_v9 = vmul.f32 %v579_v55, %v1057_v59  ;;  %v564_v12 = vrot.slane %v556_v54, 1  ;;  %v565_v13 = vrot.slane %v558_v56, 1  ;;  %v582_v16 = vmul.f32 %v579_v55, %v1061_v62 }
  0xc3   : > { %v1133_v11 = vadd.f32 %v470_v60, %v460_v63  ;;  %v507_v61 = vsel %vm272_vm9, %v505_v4, %v506_v5  ;;  %v530_v18 = vrot.slane %v521_v8, 2  ;;  %v557_v59 = vmul.f32 %v1079_v15, %v1070_v10 }
  0xc4   : > { %416 = vrot.lane.b32.xlu1 %v413_v27, %s855_s6  ;;  %v588_v19 = vrot.slane %v580_v9, 2  ;;  %v566_v21 = vsel %vm272_vm9, %v564_v12, %v565_v13  ;;  %v589_v6 = vrot.slane %v582_v16, 2  ;;  %v559_v22 = vmul.f32 %v1079_v15, %v1093_v25 }
  0xc5   : > { %546 = vrot.lane.b32.xlu0 %v542_v17, %s855_s6  ;;  %v529_v17 = vrot.slane %v519_v7, 2  ;;  %v581_v62 = vmul.f32 %v579_v55, %v1070_v10  ;;  %v567_v27 = vrot.slane %v557_v59, 1 }
  0xc6   : > { %v590_v26 = vsel %vm285_vm10, %v588_v19, %v589_v6  ;;  %v568_v28 = vrot.slane %v559_v22, 1 }
  0xc7   : > { %v531_v24 = vsel %vm285_vm10, %v529_v17, %v530_v18  ;;  %v591_v29 = vrot.slane %v581_v62, 2 }
  0xc8   : > { %486 = vrot.lane.b32.xlu1 %v481_v23, %s856_s7  ;;  %v583_v23 = vmul.f32 %v579_v55, %v1093_v25  ;;  %v569_v15 = vsel %vm272_vm9, %v567_v27, %v568_v28 }
  0xc9   : > { %508 = vrot.lane.b32.xlu0 %v504_v47, %s856_s7 }
  0xca   : > { %v592_v30 = vrot.slane %v583_v23, 2 }
  0xcc   : > { %548 = vrot.lane.b32.xlu1 %v543_v0, %s855_s6  ;;  %v593_v10 = vsel %vm285_vm10, %v591_v29, %v592_v30 }
  0xcd   : > { %532 = vrot.lane.b32.xlu0 %v528_v1, %s856_s7 }
  0xd0   : > { %510 = vrot.lane.b32.xlu1 %v507_v61, %s856_s7 }
  0xd1   : > { %570 = vrot.lane.b32.xlu0 %v566_v21, %s855_s6 }
  0xd4   : > { %534 = vrot.lane.b32.xlu1 %v531_v24, %s856_s7 }
  0xd5   : > { %594 = vrot.lane.b32.xlu0 %v590_v26, %s855_s6 }
  0xd8   : > { %572 = vrot.lane.b32.xlu1 %v569_v15, %s855_s6 }
  0xdc   : > { %596 = vrot.lane.b32.xlu1 %v593_v10, %s855_s6  ;;  %s1159_s6 = sld [smem:[#allocation3]] }
  0xe2   : > { %v421_v52 = vstv %s1159_s6 }
 0x11e   : > { %v303_v25 = vpop.permute.xlu1 %302  ;;  %v366_v31 = vpop.permute.xlu0 %365 }
 0x122   : > { %v305_v32 = vpop.permute.xlu1 %304 }
 0x123   : > { %v328_v33 = vpop.permute.xlu0 %327  ;;  %v307_v36 = vsel %vm306_vm11, %v303_v25, %v305_v32 }
 0x124   : > { %v309_v40 = vadd.f32 %v307_v36, %v290_v57 }
 0x126   : > { %v368_v34 = vpop.permute.xlu1 %367 }
 0x127   : > { %v352_v35 = vpop.permute.xlu0 %351  ;;  %v370_v45 = vsel %vm369_vm12, %v366_v31, %v368_v34 }
 0x12a   : > { %v330_v37 = vpop.permute.xlu1 %329 }
 0x12b   : > { %v391_v38 = vpop.permute.xlu0 %390  ;;  %v331_v39 = vsel %vm306_vm11, %v328_v33, %v330_v37 }
 0x12c   : > { %v333_v41 = vadd.f32 %v331_v39, %v309_v40 }
 0x12e   : > { %v354_v20 = vpop.permute.xlu1 %353 }
 0x12f   : > { %v415_v42 = vpop.permute.xlu0 %414  ;;  %v355_v43 = vsel %vm306_vm11, %v352_v35, %v354_v20 }
 0x130   : > { %v357_v44 = vadd.f32 %v355_v43, %v333_v41 }
 0x132   : > { %v393_v46 = vpop.permute.xlu1 %392  ;;  %v372_v47 = vadd.f32 %v370_v45, %v357_v44 }
 0x133   : > { %v485_v14 = vpop.permute.xlu0 %484  ;;  %v394_v48 = vsel %vm369_vm12, %v391_v38, %v393_v46 }
 0x134   : > { %v396_v49 = vadd.f32 %v394_v48, %v372_v47 }
 0x136   : > { %v417_v50 = vpop.permute.xlu1 %416 }
 0x137   : > { %v547_v51 = vpop.permute.xlu0 %546  ;;  %v418_v53 = vsel %vm369_vm12, %v415_v42, %v417_v50 }
 0x138   : > { %v420_v54 = vadd.f32 %v418_v53, %v396_v49 }
 0x13a   : > { %v422_v55 = vadd.f32 %v421_v52, %v420_v54  ;;  %v487_v56 = vpop.permute.xlu1 %486 }
 0x13b   : > { %v509_v57 = vpop.permute.xlu0 %508  ;;  %v488_v60 = vsel %vm306_vm11, %v485_v14, %v487_v56 }
 0x13c   : > { %785 = vrcp.f32 %v422_v55  ;;  %v490_v4 = vadd.f32 %v488_v60, %v1133_v11 }
 0x13e   : > { %v549_v58 = vpop.permute.xlu1 %548 }
 0x13f   : > { %v533_v63 = vpop.permute.xlu0 %532  ;;  %v550_v17 = vsel %vm369_vm12, %v547_v51, %v549_v58 }
 0x142   : > { %v511_v0 = vpop.permute.xlu1 %510 }
 0x143   : > { %v512_v1 = vsel %vm306_vm11, %v509_v57, %v511_v0  ;;  %v571_v13 = vpop.permute.xlu0 %570 }
 0x144   : > { %v514_v7 = vadd.f32 %v512_v1, %v490_v4 }
 0x146   : > { %v786_v5 = vpop.eup %785  ;;  %v535_v8 = vpop.permute.xlu1 %534 }
 0x147   : > { %v424_v9 = vmul.f32 %v786_v5, %v422_v55  ;;  %v536_v12 = vsel %vm306_vm11, %v533_v63, %v535_v8  ;;  %v595_v11 = vpop.permute.xlu0 %594 }
 0x148   : > { %v538_v16 = vadd.f32 %v536_v12, %v514_v7 }
 0x149   : > { %v425_v61 = vsub.f32 2.0, %v424_v9 }
 0x14a   : > { %v573_v18 = vpop.permute.xlu1 %572  ;;  %v552_v19 = vadd.f32 %v550_v17, %v538_v16 }
 0x14b   : > { %v426_v21 = vmul.f32 %v786_v5, %v425_v61  ;;  %v574_v6 = vsel %vm369_vm12, %v571_v13, %v573_v18 }
 0x14c   : > { %v576_v22 = vadd.f32 %v574_v6, %v552_v19 }
 0x14d   : > { %v427_v59 = vmul.f32 %v426_v21, %v951_v2 }
 0x14e   : > { %v597_v62 = vpop.permute.xlu1 %596 }
 0x14f   : > { %787 = vtanh.f32 %v427_v59  ;;  %v598_v23 = vsel %vm369_vm12, %v595_v11, %v597_v62 }
 0x150   : > { %v600_v24 = vadd.f32 %v598_v23, %v576_v22 }
 0x152   : > { %v601_v26 = vadd.f32 %v600_v24, %v421_v52 }
 0x154   : > { %789 = vrcp.f32 %v601_v26 }
 0x159   : > { %v788_v27 = vpop.eup %787 }
 0x15a   : > { %429 = vst [vmem:[%s223_s11] sm:$0xff] %v788_v27 }
 0x15e   : > { %v790_v28 = vpop.eup %789 }
 0x15f   : > { %v603_v15 = vmul.f32 %v790_v28, %v601_v26 }
 0x161   : > { %v604_v29 = vsub.f32 2.0, %v603_v15 }
 0x163   : > { %v605_v2 = vmul.f32 %v790_v28, %v604_v29 }
 0x165   : > { %v606_v30 = vmul.f32 %v953_v3, %v605_v2 }
 0x167   : > { %791 = vtanh.f32 %v606_v30 }
 0x171   : > { %v792_v10 = vpop.eup %791 }
 0x172   : > { %727 = vst [vmem:[%s223_s11 + $0x8] sm:$0xff] %v792_v10 }
 0x173 PF: > { %s15_s18 = sadd.s32 1, %s850_s18   ;;  %s1200_s14 = smov %s842_s16 }
 0x174   : > { %p12_p3 = scmp.ge.s32.totalorder %s15_s18, 6   ;;  %s1201_s15 = smov %s846_s17 }
 0x175   : > { %s1202_s16 = smov %s1205_s19  ;;  %s1203_s17 = smov %s1209_s20 }
 0x176   :  { %14 = sbr.rel (!%p12_p3) target bundleno = 5 (0x5), region = 70 }
 0x17d   :  { %640 = vsyncpa [#allocation5], 1 }
 0x17e   :  { %642 = vsyncpa [#allocation5 + $0x1], 1 }

</bundles_post_ra>
